<compile_context>
chip_gen: v5e
topology: v5e:2x2
jax: 0.10.0
libtpu: 0.0.40
codegen_flags: <defaults>
</compile_context>

<pallas_src>
import functools

import jax
import jax.numpy as jnp
from jax.experimental import pallas as pl
from jax.experimental.pallas import tpu as pltpu


def _ce_kernel(t_sref, x_ref, out_ref, *, c, ts, gs_inner, gs_total, s_total,
               needs_mask, needs_guard):
    """Accumulate per-position CE partial sums for one (batch, chunk, tile) block.

    t_sref : (n,) int32 per-batch class labels (SMEM, scalar-prefetched)
    x_ref  : (c, ts, 128) logits slab (batch block-dim squeezed)
    out_ref: (ts, 128) f32 accumulator, resident across the inner spatial grid axis
             for the current (batch, parallel-chunk).
    """
    b = pl.program_id(0)
    j = pl.program_id(1)
    s = pl.program_id(2)
    tile = j * gs_inner + s                       # logical spatial-tile index

    @pl.when(s == 0)
    def _():
        out_ref[...] = jnp.zeros_like(out_ref)

    t = t_sref[b]                                 # per-batch class label (SMEM)

    def _accumulate():
        # Class-axis reductions as unrolled elementwise passes over dense (ts, 128)
        # slabs: full sublane/lane density, no cross-sublane XLU reduce, and per-slab
        # f32 casts keep vreg live ranges small (matters for bf16 inputs).
        m = x_ref[0].astype(jnp.float32)
        for k in range(1, c):
            m = jnp.maximum(m, x_ref[k].astype(jnp.float32))
        se = jnp.exp(x_ref[0].astype(jnp.float32) - m)
        for k in range(1, c):
            se = se + jnp.exp(x_ref[k].astype(jnp.float32) - m)
        lse = m + jnp.log(se)                     # (ts, 128)

        # Direct dynamic gather of the target-class slab (leading, untiled axis).
        logit_t = x_ref[t].astype(jnp.float32)    # (ts, 128)
        loss = lse - logit_t                      # (ts, 128)

        if needs_mask:
            # Only the last spatial tile can contain padded / out-of-range positions;
            # keep the iota+compare+select off every other grid step.
            is_last = tile == gs_total - 1

            @pl.when(is_last)
            def _():
                row = jax.lax.broadcasted_iota(jnp.int32, (ts, 128), 0)
                lane = jax.lax.broadcasted_iota(jnp.int32, (ts, 128), 1)
                pos = (tile * ts + row) * 128 + lane
                out_ref[...] += jnp.where(pos < s_total, loss, jnp.float32(0.0))

            @pl.when(jnp.logical_not(is_last))
            def _():
                out_ref[...] += loss
        else:
            out_ref[...] += loss

    if needs_guard:
        # gs_total does not split evenly across the two parallel chunks: the overrun
        # steps re-read a clamped (duplicate) tile but must not accumulate it.
        @pl.when(tile < gs_total)
        def _():
            _accumulate()
    else:
        _accumulate()


def categorical_cross_entropy_pallas(input_, target, *, block_bytes=4 * 1024 * 1024):
    """input_: (n, c, d, h, w) logits; target: (n,) int class labels. Returns scalar mean CE."""
    n, c, d, h, w = input_.shape
    s_total = d * h * w
    itemsize = jnp.dtype(input_.dtype).itemsize

    # Spatial axis mapped onto BOTH sublanes and lanes: (n, c, n_rows, 128).
    n_rows = pl.cdiv(s_total, 128)
    s_pad = n_rows * 128
    x3 = input_.reshape(n, c, s_total)            # free reshape, no transpose
    if s_pad != s_total:
        # TODO(synk): jnp.pad costs one extra HBM copy; only taken when d*h*w is not a
        # multiple of 128 (padding lanes are masked out inside the kernel).
        x3 = jnp.pad(x3, ((0, 0), (0, 0), (0, s_pad - s_total)))
    x4 = x3.reshape(n, c, n_rows, 128)
    t_i32 = target.astype(jnp.int32)

    # ~block_bytes per input block, 8-row aligned (assumes c is small enough that a
    # c*8*128 slab fits comfortably in VMEM with double buffering — true for
    # segmentation-style class counts).
    ts = max(8, (block_bytes // (c * 128 * itemsize)) // 8 * 8)
    if ts >= n_rows:
        ts = n_rows                               # block spans full row axis
        gs_total = 1
    else:
        gs_total = pl.cdiv(n_rows, ts)

    # Split spatial tiles into two parallel chunks so both TensorCores on v7x get work
    # even when n == 1; no effect on single-TC v5e/v6e.
    n_par = 2 if gs_total >= 2 else 1
    gs_inner = pl.cdiv(gs_total, n_par)
    needs_guard = (n_par * gs_inner) != gs_total
    needs_mask = (gs_total * ts * 128) != s_total

    kernel = functools.partial(
        _ce_kernel, c=c, ts=ts, gs_inner=gs_inner, gs_total=gs_total,
        s_total=s_total, needs_mask=needs_mask, needs_guard=needs_guard)

    def x_index_map(b, j, s, t_ref):
        # Clamp so overrun steps of an uneven split stay in-bounds (kernel skips them).
        return (b, 0, jnp.minimum(j * gs_inner + s, gs_total - 1), 0)

    def out_index_map(b, j, s, t_ref):
        return (b, j, 0, 0)                       # resident over s for each (b, j)

    partials = pl.pallas_call(
        kernel,
        out_shape=jax.ShapeDtypeStruct((n, n_par, ts, 128), jnp.float32),
        grid_spec=pltpu.PrefetchScalarGridSpec(
            num_scalar_prefetch=1,                # target labels -> SMEM
            grid=(n, n_par, gs_inner),
            in_specs=[
                pl.BlockSpec((None, c, ts, 128), x_index_map),
            ],
            out_specs=pl.BlockSpec((None, None, ts, 128), out_index_map),
        ),
        compiler_params=pltpu.CompilerParams(
            dimension_semantics=("parallel", "parallel", "arbitrary"),
            vmem_limit_bytes=32 * 1024 * 1024,    # safe on v7x (64 MiB/TC), lifts v5e's 16 MiB default
        ),
    )(t_i32, x4)

    return jnp.sum(partials) / jnp.float32(n * s_total)


def _reference_ce(input_, target):
    """Pure-JAX reference matching F.cross_entropy(reduction='mean')."""
    n, c, d, h, w = input_.shape
    x2d = jnp.transpose(input_, (0, 2, 3, 4, 1)).reshape(-1, c).astype(jnp.float32)
    t = jnp.broadcast_to(target.astype(jnp.int32)[:, None], (n, d * h * w)).reshape(-1)
    logp = jax.nn.log_softmax(x2d, axis=-1)
    nll = -jnp.take_along_axis(logp, t[:, None], axis=-1)[:, 0]
    return jnp.mean(nll)


if __name__ == "__main__":
    k0, k1, k2, k3 = jax.random.split(jax.random.PRNGKey(0), 4)

    # Primary small config matching the module's 5-D (N, C, D, H, W) input.
    n, c, d, h, w = 2, 4, 4, 8, 8
    x = jax.random.normal(k0, (n, c, d, h, w), dtype=jnp.float32)
    target = jax.random.randint(k1, (n,), 0, c, dtype=jnp.int32)

    loss = jax.block_until_ready(categorical_cross_entropy_pallas(x, target))
    ref = jax.block_until_ready(_reference_ce(x, target))
    assert jnp.allclose(loss, ref, atol=1e-5, rtol=1e-5), (loss, ref)

    # Exercise the multi-tile / dual-parallel-chunk / uneven-split / remainder-mask
    # paths with a deliberately tiny block budget and a non-128-multiple spatial size.
    n2, c2, d2, h2, w2 = 1, 3, 3, 25, 40          # s_total = 3000
    x2 = jax.random.normal(k2, (n2, c2, d2, h2, w2), dtype=jnp.float32)
    t2 = jax.random.randint(k3, (n2,), 0, c2, dtype=jnp.int32)

    loss2 = jax.block_until_ready(
        categorical_cross_entropy_pallas(x2, t2, block_bytes=3 * 128 * 8 * 4))
    ref2 = jax.block_until_ready(_reference_ce(x2, t2))
    assert jnp.allclose(loss2, ref2, atol=1e-5, rtol=1e-5), (loss2, ref2)

    print("KERNEL_OK")
</pallas_src>

<mosaic_0001>
module attributes {stable_mosaic.version = 11 : i64} {
  func.func @_ce_kernel(%arg0: i32, %arg1: i32, %arg2: i32, %arg3: memref<2xi32, #tpu.memory_space<smem>>, %arg4: memref<1x4x2x128xf32, #tpu.memory_space<vmem>>, %arg5: memref<1x1x2x128xf32, #tpu.memory_space<vmem>>) attributes {dimension_semantics = [#tpu.dimension_semantics<parallel>, #tpu.dimension_semantics<parallel>, #tpu.dimension_semantics<arbitrary>], iteration_bounds = array<i64: 2, 1, 1>, scalar_prefetch = 1 : i64, scratch_operands = 0 : i64, tpu.core_type = #tpu.core_type<tc>, window_params = [{transform_indices = @transform_0, window_bounds = array<i64: 1, 4, 2, 128>}, {transform_indices = @transform_1, window_bounds = array<i64: 1, 1, 2, 128>}]} {
    %c0_i32 = arith.constant 0 : i32
    %0 = arith.cmpi eq, %arg2, %c0_i32 : i32
    %1 = arith.extui %0 : i1 to i32
    %c0_i32_0 = arith.constant 0 : i32
    %2 = arith.cmpi ne, %1, %c0_i32_0 : i32
    scf.if %2 {
      %cst = arith.constant 0.000000e+00 : f32
      %47 = vector.broadcast %cst : f32 to vector<2x128xf32>
      %c0_40 = arith.constant 0 : index
      %c0_41 = arith.constant 0 : index
      %c0_42 = arith.constant 0 : index
      %c0_43 = arith.constant 0 : index
      %48 = vector.load %arg5[%c0_40, %c0_41, %c0_42, %c0_43] : memref<1x1x2x128xf32, #tpu.memory_space<vmem>>, vector<1x1x2x128xf32>
      %49 = vector.shape_cast %48 : vector<1x1x2x128xf32> to vector<2x128xf32>
      %50 = vector.shape_cast %47 : vector<2x128xf32> to vector<1x1x2x128xf32>
      tpu.vector_store %arg5[%c0_40, %c0_41, %c0_42, %c0_43], %50 {strides = array<i32>} : memref<1x1x2x128xf32, #tpu.memory_space<vmem>>, vector<1x1x2x128xf32>,
    } else {
    }
    %3 = arith.index_cast %arg0 : i32 to index
    %4 = memref.load %arg3[%3] : memref<2xi32, #tpu.memory_space<smem>>
    %c0 = arith.constant 0 : index
    %c0_1 = arith.constant 0 : index
    %c0_2 = arith.constant 0 : index
    %c0_3 = arith.constant 0 : index
    %5 = vector.load %arg4[%c0, %c0_1, %c0_2, %c0_3] : memref<1x4x2x128xf32, #tpu.memory_space<vmem>>, vector<1x1x2x128xf32>
    %6 = vector.shape_cast %5 : vector<1x1x2x128xf32> to vector<2x128xf32>
    %c0_4 = arith.constant 0 : index
    %c1 = arith.constant 1 : index
    %c0_5 = arith.constant 0 : index
    %c0_6 = arith.constant 0 : index
    %7 = vector.load %arg4[%c0_4, %c1, %c0_5, %c0_6] : memref<1x4x2x128xf32, #tpu.memory_space<vmem>>, vector<1x1x2x128xf32>
    %8 = vector.shape_cast %7 : vector<1x1x2x128xf32> to vector<2x128xf32>
    %9 = arith.maximumf %6, %8 : vector<2x128xf32>
    %c0_7 = arith.constant 0 : index
    %c2 = arith.constant 2 : index
    %c0_8 = arith.constant 0 : index
    %c0_9 = arith.constant 0 : index
    %10 = vector.load %arg4[%c0_7, %c2, %c0_8, %c0_9] : memref<1x4x2x128xf32, #tpu.memory_space<vmem>>, vector<1x1x2x128xf32>
    %11 = vector.shape_cast %10 : vector<1x1x2x128xf32> to vector<2x128xf32>
    %12 = arith.maximumf %9, %11 : vector<2x128xf32>
    %c0_10 = arith.constant 0 : index
    %c3 = arith.constant 3 : index
    %c0_11 = arith.constant 0 : index
    %c0_12 = arith.constant 0 : index
    %13 = vector.load %arg4[%c0_10, %c3, %c0_11, %c0_12] : memref<1x4x2x128xf32, #tpu.memory_space<vmem>>, vector<1x1x2x128xf32>
    %14 = vector.shape_cast %13 : vector<1x1x2x128xf32> to vector<2x128xf32>
    %15 = arith.maximumf %12, %14 : vector<2x128xf32>
    %c0_13 = arith.constant 0 : index
    %c0_14 = arith.constant 0 : index
    %c0_15 = arith.constant 0 : index
    %c0_16 = arith.constant 0 : index
    %16 = vector.load %arg4[%c0_13, %c0_14, %c0_15, %c0_16] : memref<1x4x2x128xf32, #tpu.memory_space<vmem>>, vector<1x1x2x128xf32>
    %17 = vector.shape_cast %16 : vector<1x1x2x128xf32> to vector<2x128xf32>
    %18 = arith.subf %17, %15 : vector<2x128xf32>
    %19 = math.exp %18 : vector<2x128xf32>
    %c0_17 = arith.constant 0 : index
    %c1_18 = arith.constant 1 : index
    %c0_19 = arith.constant 0 : index
    %c0_20 = arith.constant 0 : index
    %20 = vector.load %arg4[%c0_17, %c1_18, %c0_19, %c0_20] : memref<1x4x2x128xf32, #tpu.memory_space<vmem>>, vector<1x1x2x128xf32>
    %21 = vector.shape_cast %20 : vector<1x1x2x128xf32> to vector<2x128xf32>
    %22 = arith.subf %21, %15 : vector<2x128xf32>
    %23 = math.exp %22 : vector<2x128xf32>
    %24 = arith.addf %19, %23 : vector<2x128xf32>
    %c0_21 = arith.constant 0 : index
    %c2_22 = arith.constant 2 : index
    %c0_23 = arith.constant 0 : index
    %c0_24 = arith.constant 0 : index
    %25 = vector.load %arg4[%c0_21, %c2_22, %c0_23, %c0_24] : memref<1x4x2x128xf32, #tpu.memory_space<vmem>>, vector<1x1x2x128xf32>
    %26 = vector.shape_cast %25 : vector<1x1x2x128xf32> to vector<2x128xf32>
    %27 = arith.subf %26, %15 : vector<2x128xf32>
    %28 = math.exp %27 : vector<2x128xf32>
    %29 = arith.addf %24, %28 : vector<2x128xf32>
    %c0_25 = arith.constant 0 : index
    %c3_26 = arith.constant 3 : index
    %c0_27 = arith.constant 0 : index
    %c0_28 = arith.constant 0 : index
    %30 = vector.load %arg4[%c0_25, %c3_26, %c0_27, %c0_28] : memref<1x4x2x128xf32, #tpu.memory_space<vmem>>, vector<1x1x2x128xf32>
    %31 = vector.shape_cast %30 : vector<1x1x2x128xf32> to vector<2x128xf32>
    %32 = arith.subf %31, %15 : vector<2x128xf32>
    %33 = math.exp %32 : vector<2x128xf32>
    %34 = arith.addf %29, %33 : vector<2x128xf32>
    %35 = math.log %34 : vector<2x128xf32>
    %36 = arith.addf %15, %35 : vector<2x128xf32>
    %c0_29 = arith.constant 0 : index
    %37 = arith.index_cast %4 : i32 to index
    %c0_30 = arith.constant 0 : index
    %c0_31 = arith.constant 0 : index
    %38 = vector.load %arg4[%c0_29, %37, %c0_30, %c0_31] : memref<1x4x2x128xf32, #tpu.memory_space<vmem>>, vector<1x1x2x128xf32>
    %39 = vector.shape_cast %38 : vector<1x1x2x128xf32> to vector<2x128xf32>
    %40 = arith.subf %36, %39 : vector<2x128xf32>
    %c0_32 = arith.constant 0 : index
    %c0_33 = arith.constant 0 : index
    %c0_34 = arith.constant 0 : index
    %c0_35 = arith.constant 0 : index
    %41 = vector.load %arg5[%c0_32, %c0_33, %c0_34, %c0_35] : memref<1x1x2x128xf32, #tpu.memory_space<vmem>>, vector<1x1x2x128xf32>
    %42 = vector.shape_cast %41 : vector<1x1x2x128xf32> to vector<2x128xf32>
    %43 = arith.addf %42, %40 : vector<2x128xf32>
    %c0_36 = arith.constant 0 : index
    %c0_37 = arith.constant 0 : index
    %c0_38 = arith.constant 0 : index
    %c0_39 = arith.constant 0 : index
    %44 = vector.load %arg5[%c0_36, %c0_37, %c0_38, %c0_39] : memref<1x1x2x128xf32, #tpu.memory_space<vmem>>, vector<1x1x2x128xf32>
    %45 = vector.shape_cast %44 : vector<1x1x2x128xf32> to vector<2x128xf32>
    %46 = vector.shape_cast %43 : vector<2x128xf32> to vector<1x1x2x128xf32>
    tpu.vector_store %arg5[%c0_36, %c0_37, %c0_38, %c0_39], %46 {strides = array<i32>} : memref<1x1x2x128xf32, #tpu.memory_space<vmem>>, vector<1x1x2x128xf32>,
    return
  }
  func.func @transform_0(%arg0: i32, %arg1: i32, %arg2: i32, %arg3: memref<2xi32, #tpu.memory_space<smem>>) -> (i32, i32, i32, i32) {
    %c1_i32 = arith.constant 1 : i32
    %0 = arith.muli %arg1, %c1_i32 : i32
    %1 = arith.addi %0, %arg2 : i32
    %c0_i32 = arith.constant 0 : i32
    %2 = arith.minsi %1, %c0_i32 : i32
    %c0_i32_0 = arith.constant 0 : i32
    %c0_i32_1 = arith.constant 0 : i32
    %c0_i32_2 = arith.constant 0 : i32
    return %arg0, %c0_i32_0, %2, %c0_i32_1 : i32, i32, i32, i32
  }
  func.func @transform_1(%arg0: i32, %arg1: i32, %arg2: i32, %arg3: memref<2xi32, #tpu.memory_space<smem>>) -> (i32, i32, i32, i32) {
    %c0_i32 = arith.constant 0 : i32
    %c0_i32_0 = arith.constant 0 : i32
    %c0_i32_1 = arith.constant 0 : i32
    return %arg0, %arg1, %c0_i32, %c0_i32_0 : i32, i32, i32, i32
  }
}

</mosaic_0001>

<bundles_post_ra>
// kernel: tpu_custom_call.1
= control target key start
LH: loop header
LB: loop body
LE: loop exit
PB: predicated region body
PF: predicated region fallthrough
CT: control target
= control target key end

     0   :  { %s549_s12 = smov [#allocation3]   ;;  %s706_s0 = inlined_call_operand.hbm [shape: s32[2], index: 0, kind: input, shape index: {}]   ;;  %s707_s1 = inlined_call_operand.hbm [shape: f32[2,4,2,128], index: 1, kind: input, shape index: {}]   ;;  %s708_s2 = inlined_call_operand.hbm [shape: f32[2,1,2,128], index: 2, kind: output, shape index: {}]  }
   0x1   :  { %s8_s11 = sshll.u32 %s706_s0, 4  ;;  %s9_s11 = int_to_ptr.hbm [resolvable:$true] %s8_s11 }
   0x2   :  { %11 = dma.hbm_to_smem %s9_s11, 16, %s549_s12, [#allocation2] }
   0x3   :  { %515 = dma.done.wait [#allocation2], 16 }
   0x4   :  { %516 = vsyncadd [#allocation2], 4294967280 }
   0x5   :  { %14 = sfence }
   0x6   :  { %15 = vsyncpa [#allocation5], 0 }
   0x7   :  { %17 = vsyncpa [#allocation5 + $0x1], 0 }
   0x8   :  { %18 = vsyncpa [#allocation6], 0 }
   0x9   :  { %20 = vsyncpa [#allocation6 + $0x1], 0  ;;  %s571_s13 = smov 0   ;;  %s573_s14 = smov 0  }
   0xa   :  { %s575_s15 = smov 0   ;;  %s577_s16 = smov 0  }
   0xb   :  { %s579_s17 = smov 0   ;;  %s581_s0 = smov 0  }
   0xc LB: > { %s326_s18 = sadd.s32 4294967295, %s547_s0   ;;  %s327_s19 = sadd.s32 4294967294, %s547_s0   ;;  %s547_s0 = sphi %s581_s0, %s26_s0   ;;  %s543_s17 = sphi %s579_s17, %s717_s17   ;;  %s539_s16 = sphi %s577_s16, %s716_s16   ;;  %s535_s15 = sphi %s575_s15, %s715_s15   ;;  %s531_s14 = sphi %s573_s14, %s714_s14   ;;  %s527_s13 = sphi %s571_s13, %s713_s13  }
   0xd   : > { %s45_s20 = sadd.s32 1, %s543_s17  ;;  %s60_s21 = sadd.s32 1, %s535_s15 }
   0xe   : > { %p47_p0 = scmp.ge.s32.totalorder %s45_s20, 2  ;;  %p67_p1 = scmp.ne.s32.totalorder %s535_s15, %s531_s14 }
   0xf   : > { %p68_p2 = scmp.eq.s32.totalorder %s547_s0, 0  ;;  %p73_p3 = scmp.ne.s32.totalorder %s531_s14, %s527_s13 }
  0x10   : > { %s719_s20 = smov (%p47_p0, %s45_s20), 0  ;;  %p74_p5 = scmp.eq.s32.totalorder %s326_s18, 0 }
  0x11   : > { %p612_p4 = por %p68_p2, %p67_p1  ;;  %s55_s23 = ssub.s32 %s543_s17, %s719_s20 }
  0x12   : > { %p99_p6 = scmp.eq.s32.totalorder %s326_s18, 1  ;;  %p58_p7 = scmp.eq.s32.totalorder %s55_s23, 0 }
  0x13   : > { %p618_p8 = por %p74_p5, %p73_p3  ;;  %p105_p10 = scmp.eq.s32.totalorder %s327_s19, 1 }
  0x14   : > { %p622_p9 = por %p99_p6, %p67_p1  ;;  %p329_p12 = scmp.ge.s32.totalorder %s547_s0, 2 }
  0x15   : > { %s627_s26 = scalar_select %p58_p7, %s535_s15, %s60_s21  }
  0x16   : > { %p629_p11 = por %p105_p10, %p73_p3  ;;  %p357_p13 = scmp.lt.s32.totalorder %s547_s0, 2 }
  0x17   : > { %s125_s28 = sand.u32 1, %s535_s15   ;;  %s344_s30 = sshll.u32 %s543_s17, 3 }
  0x18   : > { %s330_s29 = sshll.u32 %s125_s28, 3  ;;  %s138_s5 = scalar_lea.hbm %s707_s1, %s344_s30 }
  0x19   : > { %s129_s6 = scalar_lea.vmem [#allocation4], %s330_s29  ;;  %s139_s8 = sshll.u32 %s138_s5, 4  ;;  %s140_s8 = int_to_ptr.hbm [resolvable:$true] %s139_s8 }
  0x1a   : > { %s141_s7 = sshll.u32 %s129_s6, 4  ;;  %p350_p0 = pnand %p357_p13, %p612_p4  ;;  %s142_s7 = int_to_ptr.vmem [resolvable:$true] %s141_s7 }
  0x1b   : > { %p333_p1 = scmp.ge.s32.totalorder %s547_s0, 1  ;;  %s126_s9 = scalar_lea.sflag [#allocation5], %s125_s28 }
  0x1c   : > { %s550_s10 = smov 32   ;;  %s551_s11 = smov 2  }
  0x1d   : > { %352 = dma.hbm_to_vmem [thread:$0]  (!%p350_p0), %s140_s8, 128, %s142_s7, %s126_s9, %s550_s10, %s550_s10, %s551_s11  }
  0x1e   : > { %p149_p2 = scmp.lt.s32.totalorder %s547_s0, 3 }
  0x20   : > { %p150_p3 = pnand %p333_p1, %p149_p2 }
  0x21   : > { %s645_s12 = sand.u32 (!%p150_p3), 1, %s531_s14  }
  0x22   : > { %153 = sbr.rel (%p150_p3) target bundleno = 84 (0x54), region = 24  ;;  %s334_s18 = sshll.u32 (!%p150_p3), %s645_s12, 3 }
  0x23   : > { %s156_s19 = scalar_lea.sflag (!%p150_p3), [#allocation5], %s645_s12  ;;  %s649_s21 = scalar_lea.vmem (!%p150_p3), [#allocation4], %s334_s18 }
  0x27   : > { %518 = dma.done.wait (%p618_p8), %s156_s19, 128  }
  0x28   : > { %520 = vsyncadd (%p618_p8), %s156_s19, 4294967168  ;;  %s335_s22 = sshll.u32 %s645_s12, 1  ;;  %v552_v0 = vmov 0.0   ;;  %v188_v1 = vld [vmem:[%s649_s21] sm:$0x3]  ;;  %s187_s24 = sld [smem:[#allocation3 + %s539_s16]] }
  0x29   : > { %s656_s23 = scalar_lea.vmem [#allocation7], %s335_s22  ;;  %v336_v2 = vld [vmem:[%s649_s21 + $0x2] sm:$0x3]  ;;  %v337_v3 = vld [vmem:[%s649_s21 + $0x4] sm:$0x3]  ;;  %s341_s29 = sshll.u32 %s539_s16, 1 }
  0x2a   : > { %186 = vst [vmem:[%s656_s23] sm:$0x3] %v552_v0  ;;  %v191_v4 = vmax.f32 %v188_v1, %v336_v2  ;;  %v338_v5 = vld [vmem:[%s649_s21 + $0x6] sm:$0x3]  ;;  %s235_s5 = scalar_lea.hbm %s708_s2, %s341_s29  ;;  %s237_s6 = sshll.u32 %s656_s23, 4  ;;  %s238_s6 = int_to_ptr.vmem [resolvable:$true] %s237_s6 }
  0x2b   : > { %s239_s7 = sshll.u32 %s235_s5, 4  ;;  %s224_s8 = scalar_lea.sflag [#allocation6], %s645_s12  ;;  %s240_s7 = int_to_ptr.hbm [resolvable:$true] %s239_s7 }
  0x2c   : > { %v194_v6 = vmax.f32 %v191_v4, %v337_v3  ;;  %s477_s16 = sshra.s32 %s240_s7, 4  ;;  %s483_s18 = scalar_lea.hbm %s708_s2, 4  ;;  %s478_s16 = int_to_ptr.hbm [resolvable:$true] %s477_s16 }
  0x2d   : > { %s479_s9 = scalar_lea.hbm %s478_s16, 2  ;;  %p484_p7 = scmp.lt.s32.totalorder %s478_s16, %s708_s2 }
  0x2e   : > { %v197_v7 = vmax.f32 %v194_v6, %v338_v5  ;;  %s339_s28 = sshll.u32 %s187_s24, 1  ;;  %p480_p4 = scmp.ne.s32.totalorder %s478_s16, %s479_s9 }
  0x2f   : > { %s217_s30 = scalar_lea.vmem %s649_s21, %s339_s28 [#allocation4]  ;;  %p485_p8 = scmp.lt.s32.totalorder %s483_s18, %s479_s9 }
  0x30   : > { %v198_v8 = vsub.f32 %v188_v1, %v197_v7  ;;  %v201_v9 = vsub.f32 %v336_v2, %v197_v7  ;;  %v205_v10 = vsub.f32 %v337_v3, %v197_v7  ;;  %v209_v11 = vsub.f32 %v338_v5, %v197_v7  ;;  %v218_v25 = vld [vmem:[%s217_s30] sm:$0x3]  ;;  %p481_p5 = pnand %p480_p4, %p622_p9 }
  0x31   : > { %v220_v27 = vld [vmem:[%s656_s23] sm:$0x3]  ;;  %p486_p10 = por %p485_p8, %p484_p7 }
  0x32   : > { %v199_v12 = vmul.f32 1.442695, %v198_v8  ;;  %v202_v13 = vmul.f32 1.442695, %v201_v9  ;;  %v206_v14 = vmul.f32 1.442695, %v205_v10  ;;  %p482_p6 = pneg %p481_p5 }
  0x33   : > { %v210_v15 = vmul.f32 1.442695, %v209_v11 }
  0x34   : > { %411 = vpow2.f32 %v199_v12  ;;  %p487_p13 = pnand %p486_p10, %p482_p6 }
  0x35   : > { %413 = vpow2.f32 %v202_v13 }
  0x36   : > { %415 = vpow2.f32 %v206_v14 }
  0x37   : > { %417 = vpow2.f32 %v210_v15 }
  0x3a   : > { %v412_v16 = vpop.eup %411 }
  0x3b   : > { %v414_v17 = vpop.eup %413 }
  0x3c   : > { %v416_v18 = vpop.eup %415  ;;  %v204_v19 = vadd.f32 %v414_v17, %v412_v16 }
  0x3d   : > { %v418_v20 = vpop.eup %417 }
  0x3e   : > { %v208_v21 = vadd.f32 %v416_v18, %v204_v19 }
  0x40   : > { %v212_v22 = vadd.f32 %v418_v20, %v208_v21 }
  0x42   : > { %419 = vlog2.f32 %v212_v22 }
  0x48   : > { %v420_v23 = vpop.eup %419 }
  0x49   : > { %v214_v24 = vmul.f32 0.6931472, %v420_v23 }
  0x4b   : > { %v215_v26 = vadd.f32 %v214_v24, %v197_v7 }
  0x4d   : > { %v219_v28 = vsub.f32 %v215_v26, %v218_v25 }
  0x4f   : > { %v221_v29 = vadd.f32 %v220_v27, %v219_v28 }
  0x51   : > { %222 = vst [vmem:[%s656_s23] sm:$0x3] %v221_v29 }
  0x52   : > { %490 = shalt.err (!%p487_p13)
}
  0x53   : > { %347 = dma.vmem_to_hbm [thread:$0]  (%p622_p9), %s238_s6, 32, %s240_s7, %s224_s8  }
  0x54 PF: > { %s251_s12 = sand.u32 1, %s527_s13   ;;  %p354_p0 = pnand %p329_p12, %p629_p11 }
  0x55   : > { %s252_s22 = scalar_lea.sflag [#allocation6], %s251_s12 }
  0x56   : > { %p355_p1 = pneg %p354_p0 }
  0x58   : > { %522 = dma.done.wait (%p355_p1), %s252_s22, 32  }
  0x59   : > { %524 = vsyncadd (%p355_p1), %s252_s22, 4294967264  ;;  %s26_s0 = sadd.s32 1, %s547_s0   ;;  %s713_s13 = smov %s531_s14 }
  0x5a   : > { %p23_p2 = scmp.ge.s32.totalorder %s26_s0, 4   ;;  %s714_s14 = smov %s535_s15 }
  0x5b   : > { %s715_s15 = smov %s627_s26  ;;  %s716_s16 = smov %s543_s17 }
  0x5c   : > { %s717_s17 = smov %s719_s20  ;;  %25 = sbr.rel (!%p23_p2) target bundleno = 12 (0xc), region = 77 }
  0x61   :  { %258 = vsyncpa [#allocation5], 1 }
  0x62   :  { %260 = vsyncpa [#allocation5 + $0x1], 1 }
  0x63   :  { %261 = vsyncpa [#allocation6], 1 }
  0x64   :  { %263 = vsyncpa [#allocation6 + $0x1], 1 }

</bundles_post_ra>
